<compile_context>
chip_gen: v7x
topology: tpu7x:2x2x1
jax: 0.10.0
libtpu: 0.0.40
codegen_flags: <defaults>
</compile_context>

<pallas_src>
import functools
import math

import jax
import jax.numpy as jnp
from jax.experimental import pallas as pl
from jax.experimental.pallas import tpu as pltpu


def _make_assemble_kernel(y_max_len, d_model):
    """Kernel: assemble one x-row's slab pe[x, :, :] = x_full[x] + y_full[:, :]."""

    def kernel(x_full_ref, y_full_ref, o_ref):
        i = pl.program_id(0)                                  # which x coordinate
        x_row = x_full_ref[pl.ds(i, 1), :]                    # (1, d_model), dynamic row
        x_slab = jnp.broadcast_to(x_row, (y_max_len, d_model))  # sublane broadcast
        # y_full carries zeros in the x-half, x_full carries zeros in the y-half,
        # so a single add reconstructs concat([x_pe[x], y_pe[y]]).
        o_ref[0] = x_slab + y_full_ref[...]                   # (y_max, d_model) full store

    return kernel


@functools.lru_cache(maxsize=None)
def _pe_table(d_model, x_max_len, y_max_len):
    """Build the full (1, x_max_len*y_max_len, d_model) table once and cache it."""
    assert d_model % 4 == 0, "d_model must be divisible by 4 (as in the torch init)"
    half = d_model // 2

    # --- tiny per-coordinate sin/cos tables (hoisted out of the kernel) -------
    log_factor = -(math.log(10000.0) / d_model)
    div_term = jnp.exp(jnp.arange(0, half, 2, dtype=jnp.float32) * log_factor)

    pos_x = jnp.arange(x_max_len, dtype=jnp.float32)[:, None]
    pos_y = jnp.arange(y_max_len, dtype=jnp.float32)[:, None]

    x_pe = jnp.zeros((x_max_len, half), jnp.float32)
    x_pe = x_pe.at[:, 0::2].set(jnp.sin(pos_x * div_term))
    x_pe = x_pe.at[:, 1::2].set(jnp.cos(pos_x * div_term))

    y_pe = jnp.zeros((y_max_len, half), jnp.float32)
    y_pe = y_pe.at[:, 0::2].set(jnp.sin(pos_y * div_term))
    y_pe = y_pe.at[:, 1::2].set(jnp.cos(pos_y * div_term))

    # Zero-pad each small table to full d_model width so the kernel needs only
    # one broadcast + one add (no in-kernel lane concatenation).
    zeros_x = jnp.zeros((x_max_len, half), jnp.float32)
    zeros_y = jnp.zeros((y_max_len, half), jnp.float32)
    x_full = jnp.concatenate([x_pe, zeros_x], axis=1)          # (x_max, d_model)
    y_full = jnp.concatenate([zeros_y, y_pe], axis=1)          # (y_max, d_model)

    # --- Pallas assembly of the full table ------------------------------------
    kernel = _make_assemble_kernel(y_max_len, d_model)
    table = pl.pallas_call(
        kernel,
        out_shape=jax.ShapeDtypeStruct((x_max_len, y_max_len, d_model), jnp.float32),
        grid=(x_max_len,),
        in_specs=[
            # Both inputs are tiny; keep the full arrays resident every step
            # (block == full array dims -> always a legal block shape).
            pl.BlockSpec((x_max_len, d_model), lambda i: (0, 0)),
            pl.BlockSpec((y_max_len, d_model), lambda i: (0, 0)),
        ],
        out_specs=pl.BlockSpec((1, y_max_len, d_model), lambda i: (i, 0, 0)),
        compiler_params=pltpu.CompilerParams(
            dimension_semantics=("parallel",)  # >=2 steps -> both v7x TCs used
        ),
    )(x_full, y_full)

    # Free contiguous reshape (no padding to strip, no extra HBM pass).
    return table.reshape(1, x_max_len * y_max_len, d_model)


def spatial_positional_embedding_table(d_model, x_max_len=10, y_max_len=10):
    """Full cached (1, x_max*y_max, d_model) table (fuse slicing into your jit)."""
    return _pe_table(d_model, x_max_len, y_max_len)


def spatial_positional_embedding(x, d_model, x_max_len=10, y_max_len=10):
    """Pallas equivalent of SpatialPositionalEmbedding(d_model,...).forward(x)."""
    seq_len = x.shape[1]
    assert seq_len <= x_max_len * y_max_len, "seq_len exceeds positional table"
    pe = _pe_table(d_model, x_max_len, y_max_len)
    # NOTE: for zero recurring cost, prefer slicing/adding the full table inside
    # the consumer's jit (spatial_positional_embedding_table); this slice is kept
    # here only to match the torch forward() contract exactly.
    return pe[:, :seq_len]


def _reference_pe(d_model, x_max_len, y_max_len):
    """Pure-JAX replica of the torch __init__ table, for verification."""
    half = d_model // 2
    position_x = jnp.arange(x_max_len, dtype=jnp.float32)[:, None]
    position_y = jnp.arange(y_max_len, dtype=jnp.float32)[:, None]
    div_term = jnp.exp(
        jnp.arange(0, half, 2, dtype=jnp.float32) * -(math.log(10000.0) / d_model)
    )
    x_pe = jnp.zeros((x_max_len, half), jnp.float32)
    x_pe = x_pe.at[:, 0::2].set(jnp.sin(position_x * div_term))
    x_pe = x_pe.at[:, 1::2].set(jnp.cos(position_x * div_term))
    y_pe = jnp.zeros((y_max_len, half), jnp.float32)
    y_pe = y_pe.at[:, 0::2].set(jnp.sin(position_y * div_term))
    y_pe = y_pe.at[:, 1::2].set(jnp.cos(position_y * div_term))
    x_pe = jnp.tile(x_pe[:, None, :], (1, y_max_len, 1)).reshape(x_max_len * y_max_len, half)
    y_pe = jnp.tile(y_pe[None, :, :], (x_max_len, 1, 1)).reshape(x_max_len * y_max_len, half)
    pe = jnp.concatenate([x_pe, y_pe], axis=1)
    return pe[None, :, :]


if __name__ == "__main__":
    d_model = 32
    x_max_len = 10
    y_max_len = 10
    batch, seq_len = 2, 8

    key = jax.random.PRNGKey(0)
    # Forward only depends on x.shape[1]; values are unused (as in PyTorch).
    x = jax.random.normal(key, (batch, seq_len, d_model), dtype=jnp.float32)

    out = spatial_positional_embedding(x, d_model, x_max_len, y_max_len)
    out = jax.block_until_ready(out)

    ref_full = _reference_pe(d_model, x_max_len, y_max_len)
    assert out.shape == (1, seq_len, d_model), out.shape
    assert jnp.allclose(out, ref_full[:, :seq_len], atol=1e-6, rtol=1e-6), "forward mismatch"

    # Full-table parity with the torch __init__ buffer.
    pe_full = jax.block_until_ready(
        spatial_positional_embedding_table(d_model, x_max_len, y_max_len)
    )
    assert pe_full.shape == (1, x_max_len * y_max_len, d_model)
    assert jnp.allclose(pe_full, ref_full, atol=1e-6, rtol=1e-6), "table mismatch"

    # Second call with a different seq_len hits the cached table (no rebuild).
    out2 = jax.block_until_ready(
        spatial_positional_embedding(x[:, :5], d_model, x_max_len, y_max_len)
    )
    assert jnp.allclose(out2, ref_full[:, :5], atol=1e-6, rtol=1e-6)

    print("KERNEL_OK")
</pallas_src>

<mosaic_0001>
module attributes {stable_mosaic.version = 11 : i64} {
  func.func @kernel(%arg0: i32, %arg1: memref<10x32xf32, #tpu.memory_space<vmem>>, %arg2: memref<10x32xf32, #tpu.memory_space<vmem>>, %arg3: memref<1x10x32xf32, #tpu.memory_space<vmem>>) attributes {dimension_semantics = [#tpu.dimension_semantics<parallel>], iteration_bounds = array<i64: 10>, scalar_prefetch = 0 : i64, scratch_operands = 0 : i64, tpu.core_type = #tpu.core_type<tc>, window_params = [{pipeline_mode = #tpu.pipeline_mode<synchronous>, transform_indices = @transform_0, window_bounds = array<i64: 10, 32>}, {pipeline_mode = #tpu.pipeline_mode<synchronous>, transform_indices = @transform_1, window_bounds = array<i64: 10, 32>}, {transform_indices = @transform_2, window_bounds = array<i64: 1, 10, 32>}]} {
    %0 = arith.index_cast %arg0 : i32 to index
    %c0 = arith.constant 0 : index
    %1 = vector.load %arg1[%0, %c0] : memref<10x32xf32, #tpu.memory_space<vmem>>, vector<1x32xf32>
    %2 = vector.shape_cast %1 : vector<1x32xf32> to vector<1x32xf32>
    %3 = vector.broadcast %2 : vector<1x32xf32> to vector<10x32xf32>
    %c0_0 = arith.constant 0 : index
    %c0_1 = arith.constant 0 : index
    %4 = vector.load %arg2[%c0_0, %c0_1] : memref<10x32xf32, #tpu.memory_space<vmem>>, vector<10x32xf32>
    %5 = arith.addf %3, %4 : vector<10x32xf32>
    %c0_2 = arith.constant 0 : index
    %c0_3 = arith.constant 0 : index
    %c0_4 = arith.constant 0 : index
    %6 = vector.load %arg3[%c0_2, %c0_3, %c0_4] : memref<1x10x32xf32, #tpu.memory_space<vmem>>, vector<1x10x32xf32>
    %7 = vector.shape_cast %6 : vector<1x10x32xf32> to vector<10x32xf32>
    %8 = vector.shape_cast %5 : vector<10x32xf32> to vector<1x10x32xf32>
    tpu.vector_store %arg3[%c0_2, %c0_3, %c0_4], %8 {strides = array<i32>} : memref<1x10x32xf32, #tpu.memory_space<vmem>>, vector<1x10x32xf32>,
    return
  }
  func.func @transform_0(%arg0: i32) -> (i32, i32) {
    %c0_i32 = arith.constant 0 : i32
    %c0_i32_0 = arith.constant 0 : i32
    %c0_i32_1 = arith.constant 0 : i32
    return %c0_i32, %c0_i32_0 : i32, i32
  }
  func.func @transform_1(%arg0: i32) -> (i32, i32) {
    %c0_i32 = arith.constant 0 : i32
    %c0_i32_0 = arith.constant 0 : i32
    %c0_i32_1 = arith.constant 0 : i32
    return %c0_i32, %c0_i32_0 : i32, i32
  }
  func.func @transform_2(%arg0: i32) -> (i32, i32, i32) {
    %c0_i32 = arith.constant 0 : i32
    %c0_i32_0 = arith.constant 0 : i32
    %c0_i32_1 = arith.constant 0 : i32
    return %arg0, %c0_i32, %c0_i32_0 : i32, i32, i32
  }
}

</mosaic_0001>

<bundles_post_ra>
// kernel: tpu_custom_call.1
= control target key start
LH: loop header
LB: loop body
LE: loop exit
PB: predicated region body
PF: predicated region fallthrough
CT: control target
= control target key end

     0   :  { %7 = vsyncpa [#allocation3], 0  ;;  %s658_s0 = inlined_call_operand.hbm [shape: f32[10,32], index: 0, kind: input, shape index: {}]   ;;  %s659_s1 = inlined_call_operand.hbm [shape: f32[10,32], index: 1, kind: input, shape index: {}]   ;;  %s660_s2 = inlined_call_operand.hbm [shape: f32[10,10,32], index: 2, kind: output, shape index: {}]  }
   0x1   :  { %8 = vsyncpa [#allocation6], 0 }
   0x2   :  { %9 = vsyncpa [#allocation4], 0 }
   0x3   :  { %11 = vsyncpa [#allocation4 + $0x1], 0  ;;  %s487_s9 = smov 0   ;;  %s489_s10 = smov 0  }
   0x4   :  { %s491_s11 = smov 0   ;;  %s493_s12 = smov 0  }
   0x5 LB: > { %s508_s13 = sadd.s32 4294967295, %s463_s12   ;;  %s253_s14 = sadd.s32 4294967294, %s463_s12   ;;  %s463_s12 = sphi %s493_s12, %s678_s12   ;;  %s459_s11 = sphi %s491_s11, %s677_s11   ;;  %s455_s10 = sphi %s489_s10, %s676_s10   ;;  %s451_s9 = sphi %s487_s9, %s675_s9  }
   0x6   : > { %s512_s15 = sadd.s32 1, %s463_s12   ;;  %s66_s16 = sadd.s32 1, %s459_s11 }
   0x7   : > { %s63_s17 = ssub.s32 %s463_s12, %s512_s15  ;;  %p76_p0 = scmp.ne.s32.totalorder %s459_s11, %s455_s10 }
   0x8   : > { %p64_p1 = scmp.eq.s32.totalorder %s63_s17, 0  ;;  %p77_p2 = scmp.eq.s32.totalorder %s508_s13, 9 }
   0x9   : > { %p82_p3 = scmp.ne.s32.totalorder %s455_s10, %s451_s9  ;;  %p83_p4 = scmp.eq.s32.totalorder %s253_s14, 9 }
   0xa   : > { %s523_s18 = scalar_select %p64_p1, %s459_s11, %s66_s16  }
   0xb   : > { %p525_p5 = por %p77_p2, %p76_p0  ;;  %p529_p6 = por %p83_p4, %p82_p3 }
   0xc   : > { %p254_p7 = scmp.ge.s32.totalorder %s463_s12, 1  ;;  %p90_p8 = scmp.lt.s32.totalorder %s463_s12, 11 }
   0xd   : > { %s664_s19 = scalar_select %p525_p5, 1, 0 }
   0xe   : > { %s665_s20 = scalar_select %p529_p6, 1, 0 }
   0xf   : > { %p661_p9 = scmp.eq.s32.totalorder %s508_s13, 0  ;;  %p536_p10 = pnand %p254_p7, %p90_p8 }
  0x10   : > { %s465_s22 = smov [#allocation2]   ;;  %s466_s25 = smov [#allocation5]  }
  0x11   : > { %s666_s21 = scalar_select %p536_p10, 1, 0 }
  0x12   : > { %s102_s23 = sshll.u32 %s465_s22, 4  ;;  %p283_p11 = pneg %p536_p10  ;;  %s103_s23 = int_to_ptr.vmem [resolvable:$true] %s102_s23 }
  0x13   : > { %s115_s26 = sshll.u32 %s466_s25, 4  ;;  %s337_s29 = scalar_lea.hbm %s658_s0, 256  ;;  %s548_s26 = int_to_ptr.vmem [resolvable:$true] %s115_s26 }
  0x14   : > { %p544_p12 = pnand %p661_p9, %p283_p11  ;;  %p338_p13 = scmp.ne.s32.totalorder %s658_s0, %s337_s29 }
  0x15   : > { %p344_p3 = scmp.lt.u32.totalorder %s337_s29, %s658_s0 }
  0x16   : > { %p339_p0 = pneg %p544_p12 }
  0x18   : > { %p340_p1 = pnand %p339_p0, %p338_p13 }
  0x1a   : > { %p341_p2 = pneg %p340_p1 }
  0x1c   : > { %p346_p4 = pnand %p344_p3, %p341_p2 }
  0x1e   : > { %349 = shalt.err (!%p346_p4)
}
  0x1f   : > { %s350_s6 = scalar_lea.vmem %s103_s23, 256  ;;  %p358_p9 = scmp.lt.s32.totalorder %s103_s23, %s103_s23 }
  0x20   : > { %p351_p7 = scmp.ne.s32.totalorder %s103_s23, %s350_s6  ;;  %p359_p6 = scmp.lt.s32.totalorder %s350_s6, %s350_s6 }
  0x22   : > { %p353_p8 = pnand %p351_p7, %p339_p0  ;;  %p360_p5 = por %p359_p6, %p358_p9 }
  0x24   : > { %p354_p11 = pneg %p353_p8 }
  0x26   : > { %p361_p10 = pnand %p360_p5, %p354_p11 }
  0x28   : > { %364 = shalt.err (!%p361_p10)
}
  0x29   : > { %s467_s7 = smov 128   ;;  %s468_s8 = smov 8  }
  0x2a   : > { %286 = dma.hbm_to_vmem [thread:$0]  (!%p544_p12), %s658_s0, 256, %s103_s23, [#allocation3], %s467_s7, %s467_s7, %s468_s8  }
  0x2b   : > { %s365_s25 = scalar_lea.hbm %s659_s1, 256 }
  0x2c   : > { %p366_p13 = scmp.ne.s32.totalorder %s659_s1, %s365_s25  ;;  %p372_p9 = scmp.lt.u32.totalorder %s365_s25, %s659_s1 }
  0x2e   : > { %p368_p5 = pnand %p366_p13, %p339_p0 }
  0x30   : > { %p369_p6 = pneg %p368_p5 }
  0x32   : > { %p374_p10 = pnand %p372_p9, %p369_p6 }
  0x34   : > { %377 = shalt.err (!%p374_p10)
}
  0x35   : > { %s378_s23 = scalar_lea.vmem %s548_s26, 256  ;;  %p386_p4 = scmp.lt.s32.totalorder %s548_s26, %s548_s26 }
  0x36   : > { %p379_p1 = scmp.ne.s32.totalorder %s548_s26, %s378_s23  ;;  %p387_p7 = scmp.lt.s32.totalorder %s378_s23, %s378_s23 }
  0x38   : > { %p381_p2 = pnand %p379_p1, %p339_p0  ;;  %p388_p8 = por %p387_p7, %p386_p4 }
  0x3a   : > { %p382_p3 = pneg %p381_p2 }
  0x3c   : > { %p389_p11 = pnand %p388_p8, %p382_p3 }
  0x3e   : > { %392 = shalt.err (!%p389_p11)
}
  0x3f   : > { %289 = dma.hbm_to_vmem [thread:$0]  (!%p544_p12), %s659_s1, 256, %s548_s26, [#allocation6], %s467_s7, %s467_s7, %s468_s8  }
  0x40   : > { %p668_p13 = scmp.ne.s32.totalorder %s666_s21, 0 }
  0x41   : > { %p669_p5 = scmp.eq.s32.totalorder (!%p668_p13), %s508_s13, 0 }
  0x42   : > { %131 = sbr.rel (%p668_p13) target bundleno = 106 (0x6a), region = 28 }
  0x49   : > { %438 = dma.done.wait (%p669_p5), [#allocation3], 256   ;;  %p670_p0 = pmov %p669_p5 }
  0x4b   : > { %440 = vsyncadd (%p670_p0), [#allocation3], 4294967040  ;;  %p671_p6 = pmov %p670_p0 }
  0x4c   : > { %p672_p9 = pmov %p670_p0 }
  0x4d   : > { %442 = dma.done.wait (%p671_p6), [#allocation6], 256  }
  0x4e   : > { %444 = vsyncadd (%p672_p9), [#allocation6], 4294967040  ;;  %s149_s24 = sand.u32 1, %s455_s10   ;;  %s272_s6 = sshll.u32 %s508_s13, 8  ;;  %vm162_vm0 = vcmask 261120   ;;  %v158_v1 = vld [vmem:[#allocation5] sm:$0xff] }
  0x4f   : > { %s260_s26 = sshll.u32 %s149_s24, 4  ;;  %s268_s7 = scalar_lea.vmem [#allocation2], %s463_s12  ;;  %v159_v2 = vld [vmem:[#allocation5 + $0x8] sm:$0x3]  ;;  %vm164_vm1 = vcmask 254976  }
  0x50   : > { %s151_s5 = scalar_lea.vmem [#allocation7], %s260_s26  ;;  %v271_v0 = vld [vmem:[%s268_s7 - $0x1] ss:$0 sm:$0xff]  ;;  %s615_s16 = scalar_lea.hbm %s660_s2, %s272_s6 }
  0x51   : > { %s180_s21 = sshll.u32 %s151_s5, 4  ;;  %v160_v3 = vadd.f32 %v271_v0, %v158_v1  ;;  %v161_v4 = vadd.f32 %v271_v0, %v159_v2  ;;  %s617_s13 = scalar_lea.sflag [#allocation4], %s149_s24  ;;  %s610_s21 = int_to_ptr.vmem [resolvable:$true] %s180_s21 }
  0x52   : > { %s393_s17 = scalar_lea.vmem %s610_s21, 256  ;;  %p673_p10 = scmp.ne.s32.totalorder %s664_s19, 0 }
  0x53   : > { %163 = vst.msk [vmem:[%s151_s5] sm:$0xff] %vm162_vm0, %v160_v3  ;;  %p394_p12 = scmp.ne.s32.totalorder %s610_s21, %s393_s17  ;;  %s469_s22 = smov [#allocation7]  }
  0x54   : > { %165 = vst.msk [vmem:[%s151_s5 + $0x8] sm:$0x3] %vm164_vm1, %v161_v4  ;;  %s397_s25 = sshll.u32 %s469_s22, 4  ;;  %s398_s25 = int_to_ptr.vmem [resolvable:$false] %s397_s25 }
  0x55   : > { %p395_p1 = pnand %p394_p12, %p673_p10  ;;  %s399_s27 = scalar_lea.vmem %s398_s25, 512 }
  0x56   : > { %p400_p3 = scmp.lt.s32.totalorder %s610_s21, %s398_s25  ;;  %p401_p4 = scmp.lt.s32.totalorder %s399_s27, %s393_s17 }
  0x57   : > { %p396_p2 = pneg %p395_p1 }
  0x58   : > { %p402_p7 = por %p401_p4, %p400_p3 }
  0x5a   : > { %p403_p8 = pnand %p402_p7, %p396_p2 }
  0x5c   : > { %406 = shalt.err (!%p403_p8)
}
  0x5d   : > { %s407_s28 = scalar_lea.hbm %s615_s16, 256  ;;  %s411_s23 = scalar_lea.hbm %s660_s2, 2560 }
  0x5e   : > { %p408_p11 = scmp.ne.s32.totalorder %s615_s16, %s407_s28  ;;  %p412_p0 = scmp.lt.u32.totalorder %s615_s16, %s660_s2 }
  0x5f   : > { %p413_p6 = scmp.lt.u32.totalorder %s411_s23, %s407_s28  ;;  %p415_p12 = scmp.lt.u32.totalorder %s407_s28, %s615_s16 }
  0x60   : > { %p409_p13 = pnand %p408_p11, %p673_p10 }
  0x61   : > { %p414_p9 = por %p413_p6, %p412_p0 }
  0x62   : > { %p410_p5 = pneg %p409_p13 }
  0x63   : > { %p416_p1 = por %p415_p12, %p414_p9 }
  0x65   : > { %p417_p2 = pnand %p416_p1, %p410_p5 }
  0x67   : > { %420 = shalt.err (!%p417_p2)
}
  0x68   : > { %s470_s24 = smov 128   ;;  %s471_s26 = smov 8  }
  0x69   : > { %281 = dma.vmem_to_hbm [thread:$0]  (%p673_p10), %s610_s21, 256, %s615_s16, %s617_s13, %s470_s24, %s470_s24, %s471_s26  }
  0x6a PF: > { %p298_p3 = scmp.ge.s32.totalorder %s463_s12, 2  ;;  %s195_s5 = sand.u32 1, %s451_s9  }
  0x6b   : > { %p674_p4 = scmp.ne.s32.totalorder %s665_s20, 0  ;;  %s196_s6 = scalar_lea.sflag [#allocation4], %s195_s5 }
  0x6d   : > { %p291_p7 = pnand %p298_p3, %p674_p4 }
  0x6f   : > { %446 = dma.done.wait (!%p291_p7), %s196_s6, 256  }
  0x70   : > { %448 = vsyncadd (!%p291_p7), %s196_s6, 4294967040  ;;  %p14_p8 = scmp.ge.s32.totalorder %s512_s15, 12   ;;  %s675_s9 = smov %s455_s10 }
  0x71   : > { %s676_s10 = smov %s459_s11  ;;  %s677_s11 = smov %s523_s18 }
  0x72   : > { %s678_s12 = smov %s512_s15  ;;  %16 = sbr.rel (!%p14_p8) target bundleno = 5 (0x5), region = 70 }
  0x79   :  { %201 = vsyncpa [#allocation3], 1 }
  0x7a   :  { %203 = vsyncpa [#allocation3 + $0x1], 1 }
  0x7b   :  { %204 = vsyncpa [#allocation6], 1 }
  0x7c   :  { %205 = vsyncpa [#allocation4], 1 }
  0x7d   :  { %207 = vsyncpa [#allocation4 + $0x1], 1 }

</bundles_post_ra>
